<compile_context>
chip_gen: v5e
topology: v5e:2x2
jax: 0.10.0
libtpu: 0.0.40
codegen_flags: <defaults>
</compile_context>

<pallas_src>
import functools

import numpy as np
import jax
import jax.numpy as jnp
from jax.experimental import pallas as pl
from jax.experimental.pallas import tpu as pltpu

LAMDA_COOR = 5.0
LAMDA_NOOBJ = 0.5

LANES = 128
MAX_TILE_ROWS = 256   # 256 rows * 128 lanes * 30 ch * 4 B ~= 3.75 MiB per input block


# -----------------------------------------------------------------------------
# Pallas kernel
# -----------------------------------------------------------------------------
def yolo_loss_kernel(pred_ref, gt_ref, out_ref, *, inv_s, lamda_coor, lamda_noobj):
    # pred_ref / gt_ref: (30, TR, 128) f32 channel planes for one chunk of cells
    # out_ref:           (1, 1, 1)     scalar partial loss for this chunk
    gx, gy, gw, gh, gc = gt_ref[0], gt_ref[1], gt_ref[2], gt_ref[3], gt_ref[4]
    gx2, gy2, gw2, gh2 = gt_ref[5], gt_ref[6], gt_ref[7], gt_ref[8]
    px1, py1, pw1, ph1, pc1 = (pred_ref[0], pred_ref[1], pred_ref[2],
                               pred_ref[3], pred_ref[4])
    px2, py2, pw2, ph2, pc2 = (pred_ref[5], pred_ref[6], pred_ref[7],
                               pred_ref[8], pred_ref[9])

    inv_s = jnp.float32(inv_s)

    def corners(x, y, w, h):
        # The (n/S, m/S) cell offset is dropped: gt and both predicted boxes
        # live in the same cell, so the translation cancels in the IoU and in
        # the responsible-box comparison (exactly, in real arithmetic).
        cx = x * inv_s
        cy = y * inv_s
        hw = w * 0.5
        hh = h * 0.5
        return cx - hw, cy - hh, cx + hw, cy + hh

    # gt box: corners + area hoisted, shared by both IoU evaluations.
    gx1c, gy1c, gx2c, gy2c = corners(gx, gy, gw, gh)
    g_area = (gx2c - gx1c) * (gy2c - gy1c)

    def iou(x, y, w, h):
        x1, y1, x2, y2 = corners(x, y, w, h)
        iw = jnp.maximum(jnp.minimum(x2, gx2c) - jnp.maximum(x1, gx1c), 0.0)
        ih = jnp.maximum(jnp.minimum(y2, gy2c) - jnp.maximum(y1, gy1c), 0.0)
        ai = iw * ih
        p_area = (x2 - x1) * (y2 - y1)
        # Guard so dead/padded lanes never compute 0/0 (exact divide kept so the
        # responsible-box branch cannot flip on near-tied IoUs).
        denom = jnp.maximum(p_area + g_area - ai, jnp.float32(1e-12))
        return jnp.where(ai > 0.0, ai / denom, 0.0)

    iou1 = iou(px1, py1, pw1, ph1)
    iou2 = iou(px2, py2, pw2, ph2)
    resp1 = iou1 >= iou2

    # coordinate loss (responsible box)
    coord1 = ((px1 - gx) ** 2 + (py1 - gy) ** 2
              + (jnp.sqrt(pw1) - jnp.sqrt(gw)) ** 2
              + (jnp.sqrt(ph1) - jnp.sqrt(gh)) ** 2)
    coord2 = ((px2 - gx2) ** 2 + (py2 - gy2) ** 2
              + (jnp.sqrt(pw2) - jnp.sqrt(gw2)) ** 2
              + (jnp.sqrt(ph2) - jnp.sqrt(gh2)) ** 2)
    coord = jnp.where(resp1, coord1, coord2)

    # confidence loss for object cells
    conf_obj = jnp.where(
        resp1,
        (pc1 - iou1) ** 2 + lamda_noobj * (pc2 - iou2) ** 2,
        (pc2 - iou2) ** 2 + lamda_noobj * (pc1 - iou1) ** 2,
    )

    # class loss (channels 10..29): 4 independent partial chains (shorter
    # dependency chain feeding the 4 VALU slots), summed pairwise at the end.
    parts = []
    for k in range(4):
        d0 = pred_ref[10 + k] - gt_ref[10 + k]
        acc = d0 * d0
        for c in range(14 + k, 30, 4):
            d = pred_ref[c] - gt_ref[c]
            acc = acc + d * d
        parts.append(acc)
    cls = (parts[0] + parts[1]) + (parts[2] + parts[3])
    # TODO(synk): the torch forward prints per-cell argmax class labels (pure
    # side effect, does not affect the returned loss) -- omitted here.

    # no-object confidence loss
    noobj = lamda_noobj * (pc1 * pc1 + pc2 * pc2)

    is_obj = gc == 1.0
    cell_loss = jnp.where(is_obj, lamda_coor * coord + conf_obj + cls, noobj)

    # Full (sublane + lane) reduce in-kernel -> one scalar per chunk; the
    # cross-lane part goes to the otherwise-idle XLU.
    out_ref[...] = jnp.sum(cell_loss).reshape(1, 1, 1)


# -----------------------------------------------------------------------------
# Wrapper
# -----------------------------------------------------------------------------
@functools.partial(jax.jit, static_argnums=(2, 3))
def _yolov1_loss_impl(predict, ground_truth, lamda_coor, lamda_noobj):
    B, S1, S2, C = predict.shape
    assert S1 == S2 and C == 30 and ground_truth.shape == predict.shape
    S = S1
    n_cells = B * S * S
    R = pl.cdiv(n_cells, LANES)            # rows of 128 cells

    # Tiny inputs -> single block; otherwise >= 2 chunks (lets the "parallel"
    # grid axis shard across both v7x TensorCores), with up to 256-row chunks
    # (~3.75 MiB per input block) to amortize per-grid-step overhead.
    if R < 16:
        G = 1
    else:
        G = max(2, pl.cdiv(R, MAX_TILE_ROWS))
    TR = ((pl.cdiv(R, G) + 7) // 8) * 8
    R_pad = G * TR
    n_pad = R_pad * LANES

    def to_planes(x):
        # (B,S,S,30) -> (30, R_pad, 128) dense per-channel planes.
        # Padded cells are all-zero: gt conf==0 -> noobj branch -> 0 loss.
        x = jnp.asarray(x, jnp.float32).reshape(n_cells, C)
        x = jnp.pad(x, ((0, n_pad - n_cells), (0, 0)))
        return x.T.reshape(C, R_pad, LANES)
    # TODO(synk): if allow_input_fusion does not fuse the minor-dim-30 relayout,
    # the next step is to DMA native (cells, 30) blocks and transpose to channel
    # planes in-kernel on the idle XLU.

    p_cf = to_planes(predict)
    g_cf = to_planes(ground_truth)

    kernel = functools.partial(
        yolo_loss_kernel, inv_s=1.0 / float(S),
        lamda_coor=float(lamda_coor), lamda_noobj=float(lamda_noobj))

    partial_sums = pl.pallas_call(
        kernel,
        out_shape=jax.ShapeDtypeStruct((G, 1, 1), jnp.float32),
        grid=(G,),
        in_specs=[
            pl.BlockSpec((C, TR, LANES), lambda i: (0, i, 0)),
            pl.BlockSpec((C, TR, LANES), lambda i: (0, i, 0)),
        ],
        out_specs=pl.BlockSpec((1, 1, 1), lambda i: (i, 0, 0)),
        compiler_params=pltpu.CompilerParams(
            dimension_semantics=("parallel",),
            allow_input_fusion=[True, True],
            vmem_limit_bytes=40 * 1024 * 1024),
    )(p_cf, g_cf)
    # Tiny add over G per-chunk scalars (the heavy reduce already ran in-kernel).
    return jnp.sum(partial_sums)


def yolov1_loss(predict, ground_truth,
                lamda_coor=LAMDA_COOR, lamda_noobj=LAMDA_NOOBJ):
    return _yolov1_loss_impl(predict, ground_truth,
                             float(lamda_coor), float(lamda_noobj))


# -----------------------------------------------------------------------------
# Pure-Python reference (mirrors the torch loops exactly)
# -----------------------------------------------------------------------------
def _ref_target_bbox(t, S, m, n):
    cx = (t[0] + n) / S
    cy = (t[1] + m) / S
    return [cx - t[2] / 2, cy - t[3] / 2, cx + t[2] / 2, cy + t[3] / 2]


def _ref_iou(b1, b2):
    if b1[2] < b2[0] or b1[3] < b2[1] or b1[0] > b2[2] or b1[1] > b2[3]:
        return 0.0
    ix1, iy1 = max(b1[0], b2[0]), max(b1[1], b2[1])
    ix2, iy2 = min(b1[2], b2[2]), min(b1[3], b2[3])
    a1 = (b1[2] - b1[0]) * (b1[3] - b1[1])
    a2 = (b2[2] - b2[0]) * (b2[3] - b2[1])
    ai = (ix2 - ix1) * (iy2 - iy1)
    return ai / (a1 + a2 - ai) if ai > 0 else 0.0


def ref_loss(pred, gt, lc, ln):
    B, S = gt.shape[0], gt.shape[1]
    coord = conf = cls = 0.0
    for i in range(B):
        for m in range(S):
            for n in range(S):
                p, g = pred[i, m, n], gt[i, m, n]
                if g[4] == 1:
                    gb = _ref_target_bbox(g[0:4], S, m, n)
                    b1 = _ref_target_bbox(p[0:4], S, m, n)
                    b2 = _ref_target_bbox(p[5:10], S, m, n)
                    i1, i2 = _ref_iou(b1, gb), _ref_iou(b2, gb)
                    if i1 >= i2:
                        coord += ((p[0] - g[0]) ** 2 + (p[1] - g[1]) ** 2
                                  + (np.sqrt(p[2]) - np.sqrt(g[2])) ** 2
                                  + (np.sqrt(p[3]) - np.sqrt(g[3])) ** 2)
                        conf += (p[4] - i1) ** 2 + ln * (p[9] - i2) ** 2
                    else:
                        coord += ((p[5] - g[5]) ** 2 + (p[6] - g[6]) ** 2
                                  + (np.sqrt(p[7]) - np.sqrt(g[7])) ** 2
                                  + (np.sqrt(p[8]) - np.sqrt(g[8])) ** 2)
                        conf += (p[9] - i2) ** 2 + ln * (p[4] - i1) ** 2
                    cls += float(np.sum((p[10:] - g[10:]) ** 2))
                else:
                    conf += ln * (p[4] ** 2 + p[9] ** 2)
    return lc * coord + conf + cls


# -----------------------------------------------------------------------------
if __name__ == "__main__":
    B, S, C = 2, 7, 30
    key = jax.random.PRNGKey(0)
    kp, kg, km = jax.random.split(key, 3)

    predict = jax.random.uniform(kp, (B, S, S, C), jnp.float32, 0.05, 0.95)
    gt = jax.random.uniform(kg, (B, S, S, C), jnp.float32, 0.05, 0.95)
    # duplicate box into second slot, set exact 0/1 confidences
    gt = gt.at[..., 5:9].set(gt[..., 0:4])
    obj_mask = (jax.random.uniform(km, (B, S, S)) < 0.35).astype(jnp.float32)
    gt = gt.at[..., 4].set(obj_mask)
    gt = gt.at[..., 9].set(obj_mask)

    loss = yolov1_loss(predict, gt)
    loss = jax.block_until_ready(loss)

    ref = ref_loss(np.asarray(predict, np.float64), np.asarray(gt, np.float64),
                   LAMDA_COOR, LAMDA_NOOBJ)
    np.testing.assert_allclose(float(loss), float(ref), rtol=2e-3, atol=2e-3)

    print("KERNEL_OK")
</pallas_src>

<mosaic_0001>
module attributes {stable_mosaic.version = 11 : i64} {
  func.func @yolo_loss_kernel(%arg0: i32, %arg1: memref<30x8x128xf32, #tpu.memory_space<vmem>>, %arg2: memref<30x8x128xf32, #tpu.memory_space<vmem>>, %arg3: memref<1x1x1xf32, #tpu.memory_space<vmem>>) attributes {dimension_semantics = [#tpu.dimension_semantics<parallel>], iteration_bounds = array<i64: 1>, scalar_prefetch = 0 : i64, scratch_operands = 0 : i64, tpu.core_type = #tpu.core_type<tc>, window_params = [{transform_indices = @transform_0, window_bounds = array<i64: 30, 8, 128>}, {transform_indices = @transform_1, window_bounds = array<i64: 30, 8, 128>}, {transform_indices = @transform_2, window_bounds = array<i64: 1, 1, 1>}]} {
    %c0 = arith.constant 0 : index
    %c0_0 = arith.constant 0 : index
    %c0_1 = arith.constant 0 : index
    %0 = vector.load %arg2[%c0, %c0_0, %c0_1] : memref<30x8x128xf32, #tpu.memory_space<vmem>>, vector<1x8x128xf32>
    %1 = vector.shape_cast %0 : vector<1x8x128xf32> to vector<8x128xf32>
    %c1 = arith.constant 1 : index
    %c0_2 = arith.constant 0 : index
    %c0_3 = arith.constant 0 : index
    %2 = vector.load %arg2[%c1, %c0_2, %c0_3] : memref<30x8x128xf32, #tpu.memory_space<vmem>>, vector<1x8x128xf32>
    %3 = vector.shape_cast %2 : vector<1x8x128xf32> to vector<8x128xf32>
    %c2 = arith.constant 2 : index
    %c0_4 = arith.constant 0 : index
    %c0_5 = arith.constant 0 : index
    %4 = vector.load %arg2[%c2, %c0_4, %c0_5] : memref<30x8x128xf32, #tpu.memory_space<vmem>>, vector<1x8x128xf32>
    %5 = vector.shape_cast %4 : vector<1x8x128xf32> to vector<8x128xf32>
    %c3 = arith.constant 3 : index
    %c0_6 = arith.constant 0 : index
    %c0_7 = arith.constant 0 : index
    %6 = vector.load %arg2[%c3, %c0_6, %c0_7] : memref<30x8x128xf32, #tpu.memory_space<vmem>>, vector<1x8x128xf32>
    %7 = vector.shape_cast %6 : vector<1x8x128xf32> to vector<8x128xf32>
    %c4 = arith.constant 4 : index
    %c0_8 = arith.constant 0 : index
    %c0_9 = arith.constant 0 : index
    %8 = vector.load %arg2[%c4, %c0_8, %c0_9] : memref<30x8x128xf32, #tpu.memory_space<vmem>>, vector<1x8x128xf32>
    %9 = vector.shape_cast %8 : vector<1x8x128xf32> to vector<8x128xf32>
    %c5 = arith.constant 5 : index
    %c0_10 = arith.constant 0 : index
    %c0_11 = arith.constant 0 : index
    %10 = vector.load %arg2[%c5, %c0_10, %c0_11] : memref<30x8x128xf32, #tpu.memory_space<vmem>>, vector<1x8x128xf32>
    %11 = vector.shape_cast %10 : vector<1x8x128xf32> to vector<8x128xf32>
    %c6 = arith.constant 6 : index
    %c0_12 = arith.constant 0 : index
    %c0_13 = arith.constant 0 : index
    %12 = vector.load %arg2[%c6, %c0_12, %c0_13] : memref<30x8x128xf32, #tpu.memory_space<vmem>>, vector<1x8x128xf32>
    %13 = vector.shape_cast %12 : vector<1x8x128xf32> to vector<8x128xf32>
    %c7 = arith.constant 7 : index
    %c0_14 = arith.constant 0 : index
    %c0_15 = arith.constant 0 : index
    %14 = vector.load %arg2[%c7, %c0_14, %c0_15] : memref<30x8x128xf32, #tpu.memory_space<vmem>>, vector<1x8x128xf32>
    %15 = vector.shape_cast %14 : vector<1x8x128xf32> to vector<8x128xf32>
    %c8 = arith.constant 8 : index
    %c0_16 = arith.constant 0 : index
    %c0_17 = arith.constant 0 : index
    %16 = vector.load %arg2[%c8, %c0_16, %c0_17] : memref<30x8x128xf32, #tpu.memory_space<vmem>>, vector<1x8x128xf32>
    %17 = vector.shape_cast %16 : vector<1x8x128xf32> to vector<8x128xf32>
    %c0_18 = arith.constant 0 : index
    %c0_19 = arith.constant 0 : index
    %c0_20 = arith.constant 0 : index
    %18 = vector.load %arg1[%c0_18, %c0_19, %c0_20] : memref<30x8x128xf32, #tpu.memory_space<vmem>>, vector<1x8x128xf32>
    %19 = vector.shape_cast %18 : vector<1x8x128xf32> to vector<8x128xf32>
    %c1_21 = arith.constant 1 : index
    %c0_22 = arith.constant 0 : index
    %c0_23 = arith.constant 0 : index
    %20 = vector.load %arg1[%c1_21, %c0_22, %c0_23] : memref<30x8x128xf32, #tpu.memory_space<vmem>>, vector<1x8x128xf32>
    %21 = vector.shape_cast %20 : vector<1x8x128xf32> to vector<8x128xf32>
    %c2_24 = arith.constant 2 : index
    %c0_25 = arith.constant 0 : index
    %c0_26 = arith.constant 0 : index
    %22 = vector.load %arg1[%c2_24, %c0_25, %c0_26] : memref<30x8x128xf32, #tpu.memory_space<vmem>>, vector<1x8x128xf32>
    %23 = vector.shape_cast %22 : vector<1x8x128xf32> to vector<8x128xf32>
    %c3_27 = arith.constant 3 : index
    %c0_28 = arith.constant 0 : index
    %c0_29 = arith.constant 0 : index
    %24 = vector.load %arg1[%c3_27, %c0_28, %c0_29] : memref<30x8x128xf32, #tpu.memory_space<vmem>>, vector<1x8x128xf32>
    %25 = vector.shape_cast %24 : vector<1x8x128xf32> to vector<8x128xf32>
    %c4_30 = arith.constant 4 : index
    %c0_31 = arith.constant 0 : index
    %c0_32 = arith.constant 0 : index
    %26 = vector.load %arg1[%c4_30, %c0_31, %c0_32] : memref<30x8x128xf32, #tpu.memory_space<vmem>>, vector<1x8x128xf32>
    %27 = vector.shape_cast %26 : vector<1x8x128xf32> to vector<8x128xf32>
    %c5_33 = arith.constant 5 : index
    %c0_34 = arith.constant 0 : index
    %c0_35 = arith.constant 0 : index
    %28 = vector.load %arg1[%c5_33, %c0_34, %c0_35] : memref<30x8x128xf32, #tpu.memory_space<vmem>>, vector<1x8x128xf32>
    %29 = vector.shape_cast %28 : vector<1x8x128xf32> to vector<8x128xf32>
    %c6_36 = arith.constant 6 : index
    %c0_37 = arith.constant 0 : index
    %c0_38 = arith.constant 0 : index
    %30 = vector.load %arg1[%c6_36, %c0_37, %c0_38] : memref<30x8x128xf32, #tpu.memory_space<vmem>>, vector<1x8x128xf32>
    %31 = vector.shape_cast %30 : vector<1x8x128xf32> to vector<8x128xf32>
    %c7_39 = arith.constant 7 : index
    %c0_40 = arith.constant 0 : index
    %c0_41 = arith.constant 0 : index
    %32 = vector.load %arg1[%c7_39, %c0_40, %c0_41] : memref<30x8x128xf32, #tpu.memory_space<vmem>>, vector<1x8x128xf32>
    %33 = vector.shape_cast %32 : vector<1x8x128xf32> to vector<8x128xf32>
    %c8_42 = arith.constant 8 : index
    %c0_43 = arith.constant 0 : index
    %c0_44 = arith.constant 0 : index
    %34 = vector.load %arg1[%c8_42, %c0_43, %c0_44] : memref<30x8x128xf32, #tpu.memory_space<vmem>>, vector<1x8x128xf32>
    %35 = vector.shape_cast %34 : vector<1x8x128xf32> to vector<8x128xf32>
    %c9 = arith.constant 9 : index
    %c0_45 = arith.constant 0 : index
    %c0_46 = arith.constant 0 : index
    %36 = vector.load %arg1[%c9, %c0_45, %c0_46] : memref<30x8x128xf32, #tpu.memory_space<vmem>>, vector<1x8x128xf32>
    %37 = vector.shape_cast %36 : vector<1x8x128xf32> to vector<8x128xf32>
    %cst = arith.constant 0.142857149 : f32
    %38 = vector.broadcast %cst : f32 to vector<8x128xf32>
    %39 = arith.mulf %1, %38 : vector<8x128xf32>
    %cst_47 = arith.constant 0.142857149 : f32
    %40 = vector.broadcast %cst_47 : f32 to vector<8x128xf32>
    %41 = arith.mulf %3, %40 : vector<8x128xf32>
    %cst_48 = arith.constant 5.000000e-01 : f32
    %42 = vector.broadcast %cst_48 : f32 to vector<8x128xf32>
    %43 = arith.mulf %5, %42 : vector<8x128xf32>
    %cst_49 = arith.constant 5.000000e-01 : f32
    %44 = vector.broadcast %cst_49 : f32 to vector<8x128xf32>
    %45 = arith.mulf %7, %44 : vector<8x128xf32>
    %46 = arith.subf %39, %43 : vector<8x128xf32>
    %47 = arith.subf %41, %45 : vector<8x128xf32>
    %48 = arith.addf %39, %43 : vector<8x128xf32>
    %49 = arith.addf %41, %45 : vector<8x128xf32>
    %50 = arith.subf %48, %46 : vector<8x128xf32>
    %51 = arith.subf %49, %47 : vector<8x128xf32>
    %52 = arith.mulf %50, %51 : vector<8x128xf32>
    %cst_50 = arith.constant 0.142857149 : f32
    %53 = vector.broadcast %cst_50 : f32 to vector<8x128xf32>
    %54 = arith.mulf %19, %53 : vector<8x128xf32>
    %cst_51 = arith.constant 0.142857149 : f32
    %55 = vector.broadcast %cst_51 : f32 to vector<8x128xf32>
    %56 = arith.mulf %21, %55 : vector<8x128xf32>
    %cst_52 = arith.constant 5.000000e-01 : f32
    %57 = vector.broadcast %cst_52 : f32 to vector<8x128xf32>
    %58 = arith.mulf %23, %57 : vector<8x128xf32>
    %cst_53 = arith.constant 5.000000e-01 : f32
    %59 = vector.broadcast %cst_53 : f32 to vector<8x128xf32>
    %60 = arith.mulf %25, %59 : vector<8x128xf32>
    %61 = arith.subf %54, %58 : vector<8x128xf32>
    %62 = arith.subf %56, %60 : vector<8x128xf32>
    %63 = arith.addf %54, %58 : vector<8x128xf32>
    %64 = arith.addf %56, %60 : vector<8x128xf32>
    %65 = arith.minimumf %63, %48 : vector<8x128xf32>
    %66 = arith.maximumf %61, %46 : vector<8x128xf32>
    %67 = arith.subf %65, %66 : vector<8x128xf32>
    %cst_54 = arith.constant 0.000000e+00 : f32
    %68 = vector.broadcast %cst_54 : f32 to vector<8x128xf32>
    %69 = arith.maximumf %67, %68 : vector<8x128xf32>
    %70 = arith.minimumf %64, %49 : vector<8x128xf32>
    %71 = arith.maximumf %62, %47 : vector<8x128xf32>
    %72 = arith.subf %70, %71 : vector<8x128xf32>
    %cst_55 = arith.constant 0.000000e+00 : f32
    %73 = vector.broadcast %cst_55 : f32 to vector<8x128xf32>
    %74 = arith.maximumf %72, %73 : vector<8x128xf32>
    %75 = arith.mulf %69, %74 : vector<8x128xf32>
    %76 = arith.subf %63, %61 : vector<8x128xf32>
    %77 = arith.subf %64, %62 : vector<8x128xf32>
    %78 = arith.mulf %76, %77 : vector<8x128xf32>
    %79 = arith.addf %78, %52 : vector<8x128xf32>
    %80 = arith.subf %79, %75 : vector<8x128xf32>
    %cst_56 = arith.constant 9.99999996E-13 : f32
    %81 = vector.broadcast %cst_56 : f32 to vector<8x128xf32>
    %82 = arith.maximumf %80, %81 : vector<8x128xf32>
    %cst_57 = arith.constant 0.000000e+00 : f32
    %83 = vector.broadcast %cst_57 : f32 to vector<8x128xf32>
    %84 = arith.cmpf ogt, %75, %83 : vector<8x128xf32>
    %85 = arith.divf %75, %82 : vector<8x128xf32>
    %cst_58 = arith.constant 0.000000e+00 : f32
    %86 = vector.broadcast %cst_58 : f32 to vector<8x128xf32>
    %87 = arith.select %84, %85, %86 : vector<8x128xi1>, vector<8x128xf32>
    %cst_59 = arith.constant 0.142857149 : f32
    %88 = vector.broadcast %cst_59 : f32 to vector<8x128xf32>
    %89 = arith.mulf %29, %88 : vector<8x128xf32>
    %cst_60 = arith.constant 0.142857149 : f32
    %90 = vector.broadcast %cst_60 : f32 to vector<8x128xf32>
    %91 = arith.mulf %31, %90 : vector<8x128xf32>
    %cst_61 = arith.constant 5.000000e-01 : f32
    %92 = vector.broadcast %cst_61 : f32 to vector<8x128xf32>
    %93 = arith.mulf %33, %92 : vector<8x128xf32>
    %cst_62 = arith.constant 5.000000e-01 : f32
    %94 = vector.broadcast %cst_62 : f32 to vector<8x128xf32>
    %95 = arith.mulf %35, %94 : vector<8x128xf32>
    %96 = arith.subf %89, %93 : vector<8x128xf32>
    %97 = arith.subf %91, %95 : vector<8x128xf32>
    %98 = arith.addf %89, %93 : vector<8x128xf32>
    %99 = arith.addf %91, %95 : vector<8x128xf32>
    %100 = arith.minimumf %98, %48 : vector<8x128xf32>
    %101 = arith.maximumf %96, %46 : vector<8x128xf32>
    %102 = arith.subf %100, %101 : vector<8x128xf32>
    %cst_63 = arith.constant 0.000000e+00 : f32
    %103 = vector.broadcast %cst_63 : f32 to vector<8x128xf32>
    %104 = arith.maximumf %102, %103 : vector<8x128xf32>
    %105 = arith.minimumf %99, %49 : vector<8x128xf32>
    %106 = arith.maximumf %97, %47 : vector<8x128xf32>
    %107 = arith.subf %105, %106 : vector<8x128xf32>
    %cst_64 = arith.constant 0.000000e+00 : f32
    %108 = vector.broadcast %cst_64 : f32 to vector<8x128xf32>
    %109 = arith.maximumf %107, %108 : vector<8x128xf32>
    %110 = arith.mulf %104, %109 : vector<8x128xf32>
    %111 = arith.subf %98, %96 : vector<8x128xf32>
    %112 = arith.subf %99, %97 : vector<8x128xf32>
    %113 = arith.mulf %111, %112 : vector<8x128xf32>
    %114 = arith.addf %113, %52 : vector<8x128xf32>
    %115 = arith.subf %114, %110 : vector<8x128xf32>
    %cst_65 = arith.constant 9.99999996E-13 : f32
    %116 = vector.broadcast %cst_65 : f32 to vector<8x128xf32>
    %117 = arith.maximumf %115, %116 : vector<8x128xf32>
    %cst_66 = arith.constant 0.000000e+00 : f32
    %118 = vector.broadcast %cst_66 : f32 to vector<8x128xf32>
    %119 = arith.cmpf ogt, %110, %118 : vector<8x128xf32>
    %120 = arith.divf %110, %117 : vector<8x128xf32>
    %cst_67 = arith.constant 0.000000e+00 : f32
    %121 = vector.broadcast %cst_67 : f32 to vector<8x128xf32>
    %122 = arith.select %119, %120, %121 : vector<8x128xi1>, vector<8x128xf32>
    %123 = arith.cmpf oge, %87, %122 : vector<8x128xf32>
    %124 = arith.subf %19, %1 : vector<8x128xf32>
    %125 = arith.mulf %124, %124 : vector<8x128xf32>
    %126 = arith.subf %21, %3 : vector<8x128xf32>
    %127 = arith.mulf %126, %126 : vector<8x128xf32>
    %128 = arith.addf %125, %127 : vector<8x128xf32>
    %129 = math.sqrt %23 : vector<8x128xf32>
    %130 = math.sqrt %5 : vector<8x128xf32>
    %131 = arith.subf %129, %130 : vector<8x128xf32>
    %132 = arith.mulf %131, %131 : vector<8x128xf32>
    %133 = arith.addf %128, %132 : vector<8x128xf32>
    %134 = math.sqrt %25 : vector<8x128xf32>
    %135 = math.sqrt %7 : vector<8x128xf32>
    %136 = arith.subf %134, %135 : vector<8x128xf32>
    %137 = arith.mulf %136, %136 : vector<8x128xf32>
    %138 = arith.addf %133, %137 : vector<8x128xf32>
    %139 = arith.subf %29, %11 : vector<8x128xf32>
    %140 = arith.mulf %139, %139 : vector<8x128xf32>
    %141 = arith.subf %31, %13 : vector<8x128xf32>
    %142 = arith.mulf %141, %141 : vector<8x128xf32>
    %143 = arith.addf %140, %142 : vector<8x128xf32>
    %144 = math.sqrt %33 : vector<8x128xf32>
    %145 = math.sqrt %15 : vector<8x128xf32>
    %146 = arith.subf %144, %145 : vector<8x128xf32>
    %147 = arith.mulf %146, %146 : vector<8x128xf32>
    %148 = arith.addf %143, %147 : vector<8x128xf32>
    %149 = math.sqrt %35 : vector<8x128xf32>
    %150 = math.sqrt %17 : vector<8x128xf32>
    %151 = arith.subf %149, %150 : vector<8x128xf32>
    %152 = arith.mulf %151, %151 : vector<8x128xf32>
    %153 = arith.addf %148, %152 : vector<8x128xf32>
    %154 = arith.select %123, %138, %153 : vector<8x128xi1>, vector<8x128xf32>
    %155 = arith.subf %27, %87 : vector<8x128xf32>
    %156 = arith.mulf %155, %155 : vector<8x128xf32>
    %157 = arith.subf %37, %122 : vector<8x128xf32>
    %158 = arith.mulf %157, %157 : vector<8x128xf32>
    %cst_68 = arith.constant 5.000000e-01 : f32
    %159 = vector.broadcast %cst_68 : f32 to vector<8x128xf32>
    %160 = arith.mulf %159, %158 : vector<8x128xf32>
    %161 = arith.addf %156, %160 : vector<8x128xf32>
    %162 = arith.subf %37, %122 : vector<8x128xf32>
    %163 = arith.mulf %162, %162 : vector<8x128xf32>
    %164 = arith.subf %27, %87 : vector<8x128xf32>
    %165 = arith.mulf %164, %164 : vector<8x128xf32>
    %cst_69 = arith.constant 5.000000e-01 : f32
    %166 = vector.broadcast %cst_69 : f32 to vector<8x128xf32>
    %167 = arith.mulf %166, %165 : vector<8x128xf32>
    %168 = arith.addf %163, %167 : vector<8x128xf32>
    %169 = arith.select %123, %161, %168 : vector<8x128xi1>, vector<8x128xf32>
    %c10 = arith.constant 10 : index
    %c0_70 = arith.constant 0 : index
    %c0_71 = arith.constant 0 : index
    %170 = vector.load %arg1[%c10, %c0_70, %c0_71] : memref<30x8x128xf32, #tpu.memory_space<vmem>>, vector<1x8x128xf32>
    %171 = vector.shape_cast %170 : vector<1x8x128xf32> to vector<8x128xf32>
    %c10_72 = arith.constant 10 : index
    %c0_73 = arith.constant 0 : index
    %c0_74 = arith.constant 0 : index
    %172 = vector.load %arg2[%c10_72, %c0_73, %c0_74] : memref<30x8x128xf32, #tpu.memory_space<vmem>>, vector<1x8x128xf32>
    %173 = vector.shape_cast %172 : vector<1x8x128xf32> to vector<8x128xf32>
    %174 = arith.subf %171, %173 : vector<8x128xf32>
    %175 = arith.mulf %174, %174 : vector<8x128xf32>
    %c14 = arith.constant 14 : index
    %c0_75 = arith.constant 0 : index
    %c0_76 = arith.constant 0 : index
    %176 = vector.load %arg1[%c14, %c0_75, %c0_76] : memref<30x8x128xf32, #tpu.memory_space<vmem>>, vector<1x8x128xf32>
    %177 = vector.shape_cast %176 : vector<1x8x128xf32> to vector<8x128xf32>
    %c14_77 = arith.constant 14 : index
    %c0_78 = arith.constant 0 : index
    %c0_79 = arith.constant 0 : index
    %178 = vector.load %arg2[%c14_77, %c0_78, %c0_79] : memref<30x8x128xf32, #tpu.memory_space<vmem>>, vector<1x8x128xf32>
    %179 = vector.shape_cast %178 : vector<1x8x128xf32> to vector<8x128xf32>
    %180 = arith.subf %177, %179 : vector<8x128xf32>
    %181 = arith.mulf %180, %180 : vector<8x128xf32>
    %182 = arith.addf %175, %181 : vector<8x128xf32>
    %c18 = arith.constant 18 : index
    %c0_80 = arith.constant 0 : index
    %c0_81 = arith.constant 0 : index
    %183 = vector.load %arg1[%c18, %c0_80, %c0_81] : memref<30x8x128xf32, #tpu.memory_space<vmem>>, vector<1x8x128xf32>
    %184 = vector.shape_cast %183 : vector<1x8x128xf32> to vector<8x128xf32>
    %c18_82 = arith.constant 18 : index
    %c0_83 = arith.constant 0 : index
    %c0_84 = arith.constant 0 : index
    %185 = vector.load %arg2[%c18_82, %c0_83, %c0_84] : memref<30x8x128xf32, #tpu.memory_space<vmem>>, vector<1x8x128xf32>
    %186 = vector.shape_cast %185 : vector<1x8x128xf32> to vector<8x128xf32>
    %187 = arith.subf %184, %186 : vector<8x128xf32>
    %188 = arith.mulf %187, %187 : vector<8x128xf32>
    %189 = arith.addf %182, %188 : vector<8x128xf32>
    %c22 = arith.constant 22 : index
    %c0_85 = arith.constant 0 : index
    %c0_86 = arith.constant 0 : index
    %190 = vector.load %arg1[%c22, %c0_85, %c0_86] : memref<30x8x128xf32, #tpu.memory_space<vmem>>, vector<1x8x128xf32>
    %191 = vector.shape_cast %190 : vector<1x8x128xf32> to vector<8x128xf32>
    %c22_87 = arith.constant 22 : index
    %c0_88 = arith.constant 0 : index
    %c0_89 = arith.constant 0 : index
    %192 = vector.load %arg2[%c22_87, %c0_88, %c0_89] : memref<30x8x128xf32, #tpu.memory_space<vmem>>, vector<1x8x128xf32>
    %193 = vector.shape_cast %192 : vector<1x8x128xf32> to vector<8x128xf32>
    %194 = arith.subf %191, %193 : vector<8x128xf32>
    %195 = arith.mulf %194, %194 : vector<8x128xf32>
    %196 = arith.addf %189, %195 : vector<8x128xf32>
    %c26 = arith.constant 26 : index
    %c0_90 = arith.constant 0 : index
    %c0_91 = arith.constant 0 : index
    %197 = vector.load %arg1[%c26, %c0_90, %c0_91] : memref<30x8x128xf32, #tpu.memory_space<vmem>>, vector<1x8x128xf32>
    %198 = vector.shape_cast %197 : vector<1x8x128xf32> to vector<8x128xf32>
    %c26_92 = arith.constant 26 : index
    %c0_93 = arith.constant 0 : index
    %c0_94 = arith.constant 0 : index
    %199 = vector.load %arg2[%c26_92, %c0_93, %c0_94] : memref<30x8x128xf32, #tpu.memory_space<vmem>>, vector<1x8x128xf32>
    %200 = vector.shape_cast %199 : vector<1x8x128xf32> to vector<8x128xf32>
    %201 = arith.subf %198, %200 : vector<8x128xf32>
    %202 = arith.mulf %201, %201 : vector<8x128xf32>
    %203 = arith.addf %196, %202 : vector<8x128xf32>
    %c11 = arith.constant 11 : index
    %c0_95 = arith.constant 0 : index
    %c0_96 = arith.constant 0 : index
    %204 = vector.load %arg1[%c11, %c0_95, %c0_96] : memref<30x8x128xf32, #tpu.memory_space<vmem>>, vector<1x8x128xf32>
    %205 = vector.shape_cast %204 : vector<1x8x128xf32> to vector<8x128xf32>
    %c11_97 = arith.constant 11 : index
    %c0_98 = arith.constant 0 : index
    %c0_99 = arith.constant 0 : index
    %206 = vector.load %arg2[%c11_97, %c0_98, %c0_99] : memref<30x8x128xf32, #tpu.memory_space<vmem>>, vector<1x8x128xf32>
    %207 = vector.shape_cast %206 : vector<1x8x128xf32> to vector<8x128xf32>
    %208 = arith.subf %205, %207 : vector<8x128xf32>
    %209 = arith.mulf %208, %208 : vector<8x128xf32>
    %c15 = arith.constant 15 : index
    %c0_100 = arith.constant 0 : index
    %c0_101 = arith.constant 0 : index
    %210 = vector.load %arg1[%c15, %c0_100, %c0_101] : memref<30x8x128xf32, #tpu.memory_space<vmem>>, vector<1x8x128xf32>
    %211 = vector.shape_cast %210 : vector<1x8x128xf32> to vector<8x128xf32>
    %c15_102 = arith.constant 15 : index
    %c0_103 = arith.constant 0 : index
    %c0_104 = arith.constant 0 : index
    %212 = vector.load %arg2[%c15_102, %c0_103, %c0_104] : memref<30x8x128xf32, #tpu.memory_space<vmem>>, vector<1x8x128xf32>
    %213 = vector.shape_cast %212 : vector<1x8x128xf32> to vector<8x128xf32>
    %214 = arith.subf %211, %213 : vector<8x128xf32>
    %215 = arith.mulf %214, %214 : vector<8x128xf32>
    %216 = arith.addf %209, %215 : vector<8x128xf32>
    %c19 = arith.constant 19 : index
    %c0_105 = arith.constant 0 : index
    %c0_106 = arith.constant 0 : index
    %217 = vector.load %arg1[%c19, %c0_105, %c0_106] : memref<30x8x128xf32, #tpu.memory_space<vmem>>, vector<1x8x128xf32>
    %218 = vector.shape_cast %217 : vector<1x8x128xf32> to vector<8x128xf32>
    %c19_107 = arith.constant 19 : index
    %c0_108 = arith.constant 0 : index
    %c0_109 = arith.constant 0 : index
    %219 = vector.load %arg2[%c19_107, %c0_108, %c0_109] : memref<30x8x128xf32, #tpu.memory_space<vmem>>, vector<1x8x128xf32>
    %220 = vector.shape_cast %219 : vector<1x8x128xf32> to vector<8x128xf32>
    %221 = arith.subf %218, %220 : vector<8x128xf32>
    %222 = arith.mulf %221, %221 : vector<8x128xf32>
    %223 = arith.addf %216, %222 : vector<8x128xf32>
    %c23 = arith.constant 23 : index
    %c0_110 = arith.constant 0 : index
    %c0_111 = arith.constant 0 : index
    %224 = vector.load %arg1[%c23, %c0_110, %c0_111] : memref<30x8x128xf32, #tpu.memory_space<vmem>>, vector<1x8x128xf32>
    %225 = vector.shape_cast %224 : vector<1x8x128xf32> to vector<8x128xf32>
    %c23_112 = arith.constant 23 : index
    %c0_113 = arith.constant 0 : index
    %c0_114 = arith.constant 0 : index
    %226 = vector.load %arg2[%c23_112, %c0_113, %c0_114] : memref<30x8x128xf32, #tpu.memory_space<vmem>>, vector<1x8x128xf32>
    %227 = vector.shape_cast %226 : vector<1x8x128xf32> to vector<8x128xf32>
    %228 = arith.subf %225, %227 : vector<8x128xf32>
    %229 = arith.mulf %228, %228 : vector<8x128xf32>
    %230 = arith.addf %223, %229 : vector<8x128xf32>
    %c27 = arith.constant 27 : index
    %c0_115 = arith.constant 0 : index
    %c0_116 = arith.constant 0 : index
    %231 = vector.load %arg1[%c27, %c0_115, %c0_116] : memref<30x8x128xf32, #tpu.memory_space<vmem>>, vector<1x8x128xf32>
    %232 = vector.shape_cast %231 : vector<1x8x128xf32> to vector<8x128xf32>
    %c27_117 = arith.constant 27 : index
    %c0_118 = arith.constant 0 : index
    %c0_119 = arith.constant 0 : index
    %233 = vector.load %arg2[%c27_117, %c0_118, %c0_119] : memref<30x8x128xf32, #tpu.memory_space<vmem>>, vector<1x8x128xf32>
    %234 = vector.shape_cast %233 : vector<1x8x128xf32> to vector<8x128xf32>
    %235 = arith.subf %232, %234 : vector<8x128xf32>
    %236 = arith.mulf %235, %235 : vector<8x128xf32>
    %237 = arith.addf %230, %236 : vector<8x128xf32>
    %c12 = arith.constant 12 : index
    %c0_120 = arith.constant 0 : index
    %c0_121 = arith.constant 0 : index
    %238 = vector.load %arg1[%c12, %c0_120, %c0_121] : memref<30x8x128xf32, #tpu.memory_space<vmem>>, vector<1x8x128xf32>
    %239 = vector.shape_cast %238 : vector<1x8x128xf32> to vector<8x128xf32>
    %c12_122 = arith.constant 12 : index
    %c0_123 = arith.constant 0 : index
    %c0_124 = arith.constant 0 : index
    %240 = vector.load %arg2[%c12_122, %c0_123, %c0_124] : memref<30x8x128xf32, #tpu.memory_space<vmem>>, vector<1x8x128xf32>
    %241 = vector.shape_cast %240 : vector<1x8x128xf32> to vector<8x128xf32>
    %242 = arith.subf %239, %241 : vector<8x128xf32>
    %243 = arith.mulf %242, %242 : vector<8x128xf32>
    %c16 = arith.constant 16 : index
    %c0_125 = arith.constant 0 : index
    %c0_126 = arith.constant 0 : index
    %244 = vector.load %arg1[%c16, %c0_125, %c0_126] : memref<30x8x128xf32, #tpu.memory_space<vmem>>, vector<1x8x128xf32>
    %245 = vector.shape_cast %244 : vector<1x8x128xf32> to vector<8x128xf32>
    %c16_127 = arith.constant 16 : index
    %c0_128 = arith.constant 0 : index
    %c0_129 = arith.constant 0 : index
    %246 = vector.load %arg2[%c16_127, %c0_128, %c0_129] : memref<30x8x128xf32, #tpu.memory_space<vmem>>, vector<1x8x128xf32>
    %247 = vector.shape_cast %246 : vector<1x8x128xf32> to vector<8x128xf32>
    %248 = arith.subf %245, %247 : vector<8x128xf32>
    %249 = arith.mulf %248, %248 : vector<8x128xf32>
    %250 = arith.addf %243, %249 : vector<8x128xf32>
    %c20 = arith.constant 20 : index
    %c0_130 = arith.constant 0 : index
    %c0_131 = arith.constant 0 : index
    %251 = vector.load %arg1[%c20, %c0_130, %c0_131] : memref<30x8x128xf32, #tpu.memory_space<vmem>>, vector<1x8x128xf32>
    %252 = vector.shape_cast %251 : vector<1x8x128xf32> to vector<8x128xf32>
    %c20_132 = arith.constant 20 : index
    %c0_133 = arith.constant 0 : index
    %c0_134 = arith.constant 0 : index
    %253 = vector.load %arg2[%c20_132, %c0_133, %c0_134] : memref<30x8x128xf32, #tpu.memory_space<vmem>>, vector<1x8x128xf32>
    %254 = vector.shape_cast %253 : vector<1x8x128xf32> to vector<8x128xf32>
    %255 = arith.subf %252, %254 : vector<8x128xf32>
    %256 = arith.mulf %255, %255 : vector<8x128xf32>
    %257 = arith.addf %250, %256 : vector<8x128xf32>
    %c24 = arith.constant 24 : index
    %c0_135 = arith.constant 0 : index
    %c0_136 = arith.constant 0 : index
    %258 = vector.load %arg1[%c24, %c0_135, %c0_136] : memref<30x8x128xf32, #tpu.memory_space<vmem>>, vector<1x8x128xf32>
    %259 = vector.shape_cast %258 : vector<1x8x128xf32> to vector<8x128xf32>
    %c24_137 = arith.constant 24 : index
    %c0_138 = arith.constant 0 : index
    %c0_139 = arith.constant 0 : index
    %260 = vector.load %arg2[%c24_137, %c0_138, %c0_139] : memref<30x8x128xf32, #tpu.memory_space<vmem>>, vector<1x8x128xf32>
    %261 = vector.shape_cast %260 : vector<1x8x128xf32> to vector<8x128xf32>
    %262 = arith.subf %259, %261 : vector<8x128xf32>
    %263 = arith.mulf %262, %262 : vector<8x128xf32>
    %264 = arith.addf %257, %263 : vector<8x128xf32>
    %c28 = arith.constant 28 : index
    %c0_140 = arith.constant 0 : index
    %c0_141 = arith.constant 0 : index
    %265 = vector.load %arg1[%c28, %c0_140, %c0_141] : memref<30x8x128xf32, #tpu.memory_space<vmem>>, vector<1x8x128xf32>
    %266 = vector.shape_cast %265 : vector<1x8x128xf32> to vector<8x128xf32>
    %c28_142 = arith.constant 28 : index
    %c0_143 = arith.constant 0 : index
    %c0_144 = arith.constant 0 : index
    %267 = vector.load %arg2[%c28_142, %c0_143, %c0_144] : memref<30x8x128xf32, #tpu.memory_space<vmem>>, vector<1x8x128xf32>
    %268 = vector.shape_cast %267 : vector<1x8x128xf32> to vector<8x128xf32>
    %269 = arith.subf %266, %268 : vector<8x128xf32>
    %270 = arith.mulf %269, %269 : vector<8x128xf32>
    %271 = arith.addf %264, %270 : vector<8x128xf32>
    %c13 = arith.constant 13 : index
    %c0_145 = arith.constant 0 : index
    %c0_146 = arith.constant 0 : index
    %272 = vector.load %arg1[%c13, %c0_145, %c0_146] : memref<30x8x128xf32, #tpu.memory_space<vmem>>, vector<1x8x128xf32>
    %273 = vector.shape_cast %272 : vector<1x8x128xf32> to vector<8x128xf32>
    %c13_147 = arith.constant 13 : index
    %c0_148 = arith.constant 0 : index
    %c0_149 = arith.constant 0 : index
    %274 = vector.load %arg2[%c13_147, %c0_148, %c0_149] : memref<30x8x128xf32, #tpu.memory_space<vmem>>, vector<1x8x128xf32>
    %275 = vector.shape_cast %274 : vector<1x8x128xf32> to vector<8x128xf32>
    %276 = arith.subf %273, %275 : vector<8x128xf32>
    %277 = arith.mulf %276, %276 : vector<8x128xf32>
    %c17 = arith.constant 17 : index
    %c0_150 = arith.constant 0 : index
    %c0_151 = arith.constant 0 : index
    %278 = vector.load %arg1[%c17, %c0_150, %c0_151] : memref<30x8x128xf32, #tpu.memory_space<vmem>>, vector<1x8x128xf32>
    %279 = vector.shape_cast %278 : vector<1x8x128xf32> to vector<8x128xf32>
    %c17_152 = arith.constant 17 : index
    %c0_153 = arith.constant 0 : index
    %c0_154 = arith.constant 0 : index
    %280 = vector.load %arg2[%c17_152, %c0_153, %c0_154] : memref<30x8x128xf32, #tpu.memory_space<vmem>>, vector<1x8x128xf32>
    %281 = vector.shape_cast %280 : vector<1x8x128xf32> to vector<8x128xf32>
    %282 = arith.subf %279, %281 : vector<8x128xf32>
    %283 = arith.mulf %282, %282 : vector<8x128xf32>
    %284 = arith.addf %277, %283 : vector<8x128xf32>
    %c21 = arith.constant 21 : index
    %c0_155 = arith.constant 0 : index
    %c0_156 = arith.constant 0 : index
    %285 = vector.load %arg1[%c21, %c0_155, %c0_156] : memref<30x8x128xf32, #tpu.memory_space<vmem>>, vector<1x8x128xf32>
    %286 = vector.shape_cast %285 : vector<1x8x128xf32> to vector<8x128xf32>
    %c21_157 = arith.constant 21 : index
    %c0_158 = arith.constant 0 : index
    %c0_159 = arith.constant 0 : index
    %287 = vector.load %arg2[%c21_157, %c0_158, %c0_159] : memref<30x8x128xf32, #tpu.memory_space<vmem>>, vector<1x8x128xf32>
    %288 = vector.shape_cast %287 : vector<1x8x128xf32> to vector<8x128xf32>
    %289 = arith.subf %286, %288 : vector<8x128xf32>
    %290 = arith.mulf %289, %289 : vector<8x128xf32>
    %291 = arith.addf %284, %290 : vector<8x128xf32>
    %c25 = arith.constant 25 : index
    %c0_160 = arith.constant 0 : index
    %c0_161 = arith.constant 0 : index
    %292 = vector.load %arg1[%c25, %c0_160, %c0_161] : memref<30x8x128xf32, #tpu.memory_space<vmem>>, vector<1x8x128xf32>
    %293 = vector.shape_cast %292 : vector<1x8x128xf32> to vector<8x128xf32>
    %c25_162 = arith.constant 25 : index
    %c0_163 = arith.constant 0 : index
    %c0_164 = arith.constant 0 : index
    %294 = vector.load %arg2[%c25_162, %c0_163, %c0_164] : memref<30x8x128xf32, #tpu.memory_space<vmem>>, vector<1x8x128xf32>
    %295 = vector.shape_cast %294 : vector<1x8x128xf32> to vector<8x128xf32>
    %296 = arith.subf %293, %295 : vector<8x128xf32>
    %297 = arith.mulf %296, %296 : vector<8x128xf32>
    %298 = arith.addf %291, %297 : vector<8x128xf32>
    %c29 = arith.constant 29 : index
    %c0_165 = arith.constant 0 : index
    %c0_166 = arith.constant 0 : index
    %299 = vector.load %arg1[%c29, %c0_165, %c0_166] : memref<30x8x128xf32, #tpu.memory_space<vmem>>, vector<1x8x128xf32>
    %300 = vector.shape_cast %299 : vector<1x8x128xf32> to vector<8x128xf32>
    %c29_167 = arith.constant 29 : index
    %c0_168 = arith.constant 0 : index
    %c0_169 = arith.constant 0 : index
    %301 = vector.load %arg2[%c29_167, %c0_168, %c0_169] : memref<30x8x128xf32, #tpu.memory_space<vmem>>, vector<1x8x128xf32>
    %302 = vector.shape_cast %301 : vector<1x8x128xf32> to vector<8x128xf32>
    %303 = arith.subf %300, %302 : vector<8x128xf32>
    %304 = arith.mulf %303, %303 : vector<8x128xf32>
    %305 = arith.addf %298, %304 : vector<8x128xf32>
    %306 = arith.addf %203, %237 : vector<8x128xf32>
    %307 = arith.addf %271, %305 : vector<8x128xf32>
    %308 = arith.addf %306, %307 : vector<8x128xf32>
    %309 = arith.mulf %27, %27 : vector<8x128xf32>
    %310 = arith.mulf %37, %37 : vector<8x128xf32>
    %311 = arith.addf %309, %310 : vector<8x128xf32>
    %cst_170 = arith.constant 5.000000e-01 : f32
    %312 = vector.broadcast %cst_170 : f32 to vector<8x128xf32>
    %313 = arith.mulf %312, %311 : vector<8x128xf32>
    %cst_171 = arith.constant 1.000000e+00 : f32
    %314 = vector.broadcast %cst_171 : f32 to vector<8x128xf32>
    %315 = arith.cmpf oeq, %9, %314 : vector<8x128xf32>
    %cst_172 = arith.constant 5.000000e+00 : f32
    %316 = vector.broadcast %cst_172 : f32 to vector<8x128xf32>
    %317 = arith.mulf %316, %154 : vector<8x128xf32>
    %318 = arith.addf %317, %169 : vector<8x128xf32>
    %319 = arith.addf %318, %308 : vector<8x128xf32>
    %320 = arith.select %315, %319, %313 : vector<8x128xi1>, vector<8x128xf32>
    %321 = vector.shape_cast %320 : vector<8x128xf32> to vector<1x8x128xf32>
    %cst_173 = arith.constant dense<0.000000e+00> : vector<1xf32>
    %322 = vector.multi_reduction <add>, %321, %cst_173 [1, 2] : vector<1x8x128xf32> to vector<1xf32>
    %323 = vector.shape_cast %322 : vector<1xf32> to vector<1x1x1xf32>
    %324 = vector.extract %323[0, 0, 0] : f32 from vector<1x1x1xf32>
    %325 = vector.broadcast %324 : f32 to vector<1x1x1xf32>
    %c0_174 = arith.constant 0 : index
    %c0_175 = arith.constant 0 : index
    %c0_176 = arith.constant 0 : index
    %326 = vector.load %arg3[%c0_174, %c0_175, %c0_176] : memref<1x1x1xf32, #tpu.memory_space<vmem>>, vector<1x1x1xf32>
    tpu.vector_store %arg3[%c0_174, %c0_175, %c0_176], %325 {strides = array<i32>} : memref<1x1x1xf32, #tpu.memory_space<vmem>>, vector<1x1x1xf32>,
    return
  }
  func.func @transform_0(%arg0: i32) -> (i32, i32, i32) {
    %c0_i32 = arith.constant 0 : i32
    %c0_i32_0 = arith.constant 0 : i32
    %c0_i32_1 = arith.constant 0 : i32
    return %c0_i32, %arg0, %c0_i32_0 : i32, i32, i32
  }
  func.func @transform_1(%arg0: i32) -> (i32, i32, i32) {
    %c0_i32 = arith.constant 0 : i32
    %c0_i32_0 = arith.constant 0 : i32
    %c0_i32_1 = arith.constant 0 : i32
    return %c0_i32, %arg0, %c0_i32_0 : i32, i32, i32
  }
  func.func @transform_2(%arg0: i32) -> (i32, i32, i32) {
    %c0_i32 = arith.constant 0 : i32
    %c0_i32_0 = arith.constant 0 : i32
    %c0_i32_1 = arith.constant 0 : i32
    return %arg0, %c0_i32, %c0_i32_0 : i32, i32, i32
  }
}

</mosaic_0001>

<bundles_post_ra>
// kernel: _yolov1_loss_impl.1
= control target key start
LH: loop header
LB: loop body
LE: loop exit
PB: predicated region body
PF: predicated region fallthrough
CT: control target
= control target key end

     0   :  { %7 = vsyncpa [#allocation3], 0  ;;  %s550_s14 = smov [#allocation2]   ;;  %s1018_s0 = inlined_call_operand.vmem [shape: f32[30,8,128], index: 0, kind: input, shape index: {}]   ;;  %s1019_s1 = inlined_call_operand.vmem [shape: f32[30,8,128], index: 1, kind: input, shape index: {}]   ;;  %s1020_s2 = inlined_call_operand.hbm [shape: f32[1,1,1], index: 2, kind: output, shape index: {}]  }
   0x1   :  { %v569_v0 = vld [vmem:[%s1019_s1] sm:$0xff]  ;;  %v574_v1 = vld [vmem:[%s1019_s1 + $0x8] sm:$0xff]  ;;  %v579_v2 = vld [vmem:[%s1019_s1 + $0x10] sm:$0xff]  ;;  %s433_s15 = sshll.u32 %s550_s14, 4  ;;  %s435_s17 = sshll.u32 %s1020_s2, 4  ;;  %s434_s15 = int_to_ptr.vmem [resolvable:$true] %s433_s15  ;;  %s436_s17 = int_to_ptr.hbm [resolvable:$true] %s435_s17 }
   0x2   :  { %v584_v3 = vld [vmem:[%s1019_s1 + $0x18] sm:$0xff]  ;;  %v48_v4 = vmul.f32 0.14285715, %v569_v0  ;;  %v49_v5 = vmul.f32 0.14285715, %v574_v1  ;;  %v50_v6 = vmul.f32 0.5, %v579_v2  ;;  %504 = vrsqrt.f32 %v579_v2 }
   0x3   :  { %v592_v7 = vld [vmem:[%s1018_s0] sm:$0xff]  ;;  %v597_v8 = vld [vmem:[%s1018_s0 + $0x8] sm:$0xff]  ;;  %v51_v9 = vmul.f32 0.5, %v584_v3  ;;  %v603_v10 = vld [vmem:[%s1018_s0 + $0x10] sm:$0xff]  ;;  %506 = vrsqrt.f32 %v584_v3  ;;  %vm164_vm1 = vcmp.eq.f32.partialorder %v579_v2, inf  ;;  %vm166_vm5 = vcmp.eq.f32.partialorder %v579_v2, 0.0 }
   0x4   :  { %v608_v11 = vld [vmem:[%s1018_s0 + $0x18] sm:$0xff]  ;;  %v52_v12 = vsub.f32 %v48_v4, %v50_v6  ;;  %v54_v13 = vadd.f32 %v50_v6, %v48_v4  ;;  %v59_v14 = vmul.f32 0.14285715, %v592_v7  ;;  %v615_v15 = vld [vmem:[%s1018_s0 + $0x28] sm:$0xff]  ;;  %v620_v16 = vld [vmem:[%s1018_s0 + $0x30] sm:$0xff]  ;;  %v61_v21 = vmul.f32 0.5, %v603_v10 }
   0x5   :  { %v625_v17 = vld [vmem:[%s1018_s0 + $0x38] sm:$0xff]  ;;  %v53_v18 = vsub.f32 %v49_v5, %v51_v9  ;;  %v55_v19 = vadd.f32 %v51_v9, %v49_v5  ;;  %v60_v20 = vmul.f32 0.14285715, %v597_v8  ;;  %v632_v22 = vld [vmem:[%s1018_s0 + $0x40] sm:$0xff]  ;;  %v62_v24 = vmul.f32 0.5, %v608_v11 }
   0x6   :  { %v56_v23 = vsub.f32 %v54_v13, %v52_v12  ;;  %v99_v25 = vmul.f32 0.14285715, %v615_v15  ;;  %v101_v26 = vmul.f32 0.5, %v625_v17  ;;  %v63_v28 = vsub.f32 %v59_v14, %v61_v21 }
   0x7   :  { %v57_v27 = vsub.f32 %v55_v19, %v53_v18  ;;  %v65_v29 = vadd.f32 %v61_v21, %v59_v14  ;;  %v100_v30 = vmul.f32 0.14285715, %v620_v16  ;;  %v64_v31 = vsub.f32 %v60_v20, %v62_v24  ;;  %v663_v21 = vld [vmem:[%s1019_s1 + $0x38] sm:$0xff] }
   0x8   :  { %v66_v32 = vadd.f32 %v62_v24, %v60_v20  ;;  %v102_v33 = vmul.f32 0.5, %v632_v22  ;;  %v103_v34 = vsub.f32 %v99_v25, %v101_v26  ;;  %v68_v37 = vmax.f32 %v63_v28, %v52_v12  ;;  %v639_v39 = vpop.eup %504 }
   0x9   :  { %v58_v35 = vmul.f32 %v57_v27, %v56_v23  ;;  %v67_v36 = vmin.f32 %v65_v29, %v54_v13  ;;  %v76_v38 = vsub.f32 %v65_v29, %v63_v28  ;;  %v72_v41 = vmax.f32 %v64_v31, %v53_v18 }
   0xa   :  { %v71_v40 = vmin.f32 %v66_v32, %v55_v19  ;;  %v77_v42 = vsub.f32 %v66_v32, %v64_v31  ;;  %v104_v43 = vsub.f32 %v100_v30, %v102_v33  ;;  %v105_v45 = vadd.f32 %v101_v26, %v99_v25 }
   0xb   :  { %v69_v44 = vsub.f32 %v67_v36, %v68_v37  ;;  %v106_v46 = vadd.f32 %v102_v33, %v100_v30  ;;  %v108_v47 = vmax.f32 %v103_v34, %v52_v12  ;;  %508 = vrsqrt.f32 %v603_v10 }
   0xc   :  { %v73_v48 = vsub.f32 %v71_v40, %v72_v41  ;;  %v78_v49 = vmul.f32 %v77_v42, %v76_v38  ;;  %v112_v50 = vmax.f32 %v104_v43, %v53_v18  ;;  %v107_v52 = vmin.f32 %v105_v45, %v54_v13  ;;  %v652_v13 = vpop.eup %506 }
   0xd   :  { %v70_v51 = vmax.f32 %v69_v44, 0.0  ;;  %v111_v53 = vmin.f32 %v106_v46, %v55_v19  ;;  %v116_v54 = vsub.f32 %v105_v45, %v103_v34  ;;  %v117_v57 = vsub.f32 %v106_v46, %v104_v43  ;;  %v448_v44 = vld [vmem:[%s1019_s1 + $0x28] sm:$0xff] }
   0xe   :  { %v74_v55 = vmax.f32 %v73_v48, 0.0  ;;  %v79_v56 = vadd.f32 %v78_v49, %v58_v35  ;;  %v109_v58 = vsub.f32 %v107_v52, %v108_v47  ;;  %v158_v6 = vmul.f32 %v639_v39, %v579_v2 }
   0xf   :  { %v113_v59 = vsub.f32 %v111_v53, %v112_v50  ;;  %v118_v61 = vmul.f32 %v117_v57, %v116_v54  ;;  %v140_v12 = vsub.f32 %v592_v7, %v569_v0  ;;  %v142_v18 = vsub.f32 %v597_v8, %v574_v1 }
  0x10   :  { %v643_v60 = vmul.f32 %v74_v55, %v70_v51  ;;  %v110_v62 = vmax.f32 %v109_v58, 0.0  ;;  %v159_v19 = vmul.f32 %v639_v39, %v158_v6  ;;  %510 = vrsqrt.f32 %v608_v11 }
  0x11   :  { %v114_v63 = vmax.f32 %v113_v59, 0.0  ;;  %v119_v5 = vadd.f32 %v118_v61, %v58_v35  ;;  %v509_v20 = vpop.eup %508  ;;  %v672_v25 = vmul.f32 %v140_v12, %v140_v12  ;;  %v674_v26 = vmul.f32 %v142_v18, %v142_v18 }
  0x12   :  { %v80_v4 = vsub.f32 %v79_v56, %v643_v60  ;;  %v146_v1 = vmul.f32 %v509_v20, %v603_v10  ;;  %v160_v8 = vmul.f32 0.5, %v159_v19  ;;  %v185_v27 = vmul.f32 %v652_v13, %v584_v3  ;;  %v466_v56 = vld [vmem:[%s1019_s1 + $0x90] sm:$0xff] }
  0x13   :  { %v648_v9 = vmul.f32 %v114_v63, %v110_v62  ;;  %vm152_vm0 = vcmp.eq.f32.partialorder %v603_v10, inf  ;;  %v155_v28 = vand.u32 2147483648, %v603_v10  ;;  %v167_v29 = vand.u32 2147483648, %v579_v2 }
  0x14   :  { %v654_v14 = vmax.f32 %v80_v4, 1e-12  ;;  %v147_v31 = vmul.f32 %v509_v20, %v146_v1  ;;  %v161_v32 = vsub.f32 1.5, %v160_v8  ;;  %v186_v33 = vmul.f32 %v652_v13, %v185_v27 }
  0x15   :  { %v120_v23 = vsub.f32 %v119_v5, %v648_v9  ;;  %vm154_vm4 = vcmp.eq.f32.partialorder %v603_v10, 0.0  ;;  %v182_v37 = vand.u32 2147483648, %v608_v11  ;;  %vm179_vm6 = vcmp.eq.f32.partialorder %v608_v11, inf }
  0x16   :  { %512 = vrcp.f32 %v654_v14  ;;  %v92_v0 = vand.u32 2147483647, %v654_v14  ;;  %v94_v7 = vand.u32 2147483648, %v654_v14  ;;  %v511_v30 = vpop.eup %510  ;;  %vm88_vm2 = vweird.f32 %v654_v14 }
  0x17   :  { %v669_v24 = vmax.f32 %v120_v23, 1e-12  ;;  %514 = vrsqrt.f32 %v663_v21  ;;  %v173_v36 = vmul.f32 %v511_v30, %v608_v11  ;;  %v148_v41 = vmul.f32 0.5, %v147_v31 }
  0x18   :  { %vm686_vm3 = vcmp.eq.f32.partialorder %v92_v0, 8.507059e+37  ;;  %v95_v35 = vor.u32 1.1754944e-38, %v94_v7  ;;  %v162_v42 = vmul.f32 %v639_v39, %v161_v32  ;;  %v187_v43 = vmul.f32 0.5, %v186_v33  ;;  %v449_v39 = vld [vmem:[%s1019_s1 + $0x30] sm:$0xff] }
  0x19   :  { %516 = vrcp.f32 %v669_v24  ;;  %v132_v40 = vand.u32 2147483647, %v669_v24  ;;  %vm128_vm7 = vweird.f32 %v669_v24  ;;  %v174_v46 = vmul.f32 %v511_v30, %v173_v36 }
  0x1a   :  { %vm191_vm8 = vcmp.eq.f32.partialorder %v584_v3, inf  ;;  %v134_v48 = vand.u32 2147483648, %v669_v24  ;;  %v149_v49 = vsub.f32 1.5, %v148_v41  ;;  %v188_v50 = vsub.f32 1.5, %v187_v43 }
  0x1b   :  { %v163_v53 = vmul.f32 %v579_v2, %v162_v42  ;;  %v175_v54 = vmul.f32 0.5, %v174_v46  ;;  %vm181_vm10 = vcmp.eq.f32.partialorder %v608_v11, 0.0  ;;  %vm193_vm11 = vcmp.eq.f32.partialorder %v584_v3, 0.0  ;;  %v778_v42 = vld [vmem:[%s1019_s1 + $0x40] sm:$0xff]  ;;  %v795_v46 = vld [vmem:[%s1018_s0 + $0x48] sm:$0xff] }
  0x1c   :  { %v513_v38 = vpop.eup %512  ;;  %518 = vrsqrt.f32 %v625_v17  ;;  %vm714_vm12 = vcmp.eq.f32.partialorder %v132_v40, 8.507059e+37  ;;  %v150_v57 = vmul.f32 %v509_v20, %v149_v49  ;;  %v199_v58 = vsub.f32 %v615_v15, %v448_v44 }
  0x1d   :  { %v84_v45 = vmul.f32 %v513_v38, %v654_v14  ;;  %v703_v47 = vpop.eup %514  ;;  %vm89_vm9 = vweird.f32 %v513_v38  ;;  %v176_v61 = vsub.f32 1.5, %v175_v54  ;;  %v189_v62 = vmul.f32 %v652_v13, %v188_v50  ;;  %v462_v50 = vld [vmem:[%s1019_s1 + $0x50] sm:$0xff] }
  0x1e   :  { %v201_v63 = vsub.f32 %v620_v16, %v449_v39  ;;  %vm724_vm13 = vmor %vm88_vm2, %vm89_vm9  ;;  %v135_v6 = vor.u32 1.1754944e-38, %v134_v48  ;;  %v151_v12 = vmul.f32 %v603_v10, %v150_v57  ;;  %v165_v15 = vsel %vm164_vm1, %v579_v2, %v163_v53 }
  0x1f   :  { %v517_v51 = vpop.eup %516  ;;  %v85_v52 = vsub.f32 1.0, %v84_v45  ;;  %v177_v13 = vmul.f32 %v511_v30, %v176_v61  ;;  %v190_v16 = vmul.f32 %v584_v3, %v189_v62  ;;  %v194_v20 = vand.u32 2147483648, %v584_v3  ;;  %v790_v45 = vld [vmem:[%s1018_s0 + $0x20] sm:$0xff] }
  0x20   :  { %v124_v55 = vmul.f32 %v517_v51, %v669_v24  ;;  %vm129_vm14 = vweird.f32 %v517_v51  ;;  %v153_v14 = vsel %vm152_vm0, %v603_v10, %v151_v12  ;;  %v217_v23 = vmul.f32 %v703_v47, %v663_v21 }
  0x21   :  { %v86_v59 = vmul.f32 %v513_v38, %v85_v52  ;;  %vm743_vm15 = vmor %vm128_vm7, %vm129_vm14  ;;  %v178_v8 = vmul.f32 %v608_v11, %v177_v13  ;;  %v200_v27 = vmul.f32 %v199_v58, %v199_v58  ;;  %v202_v30 = vmul.f32 %v201_v63, %v201_v63  ;;  %v467_v58 = vld [vmem:[%s1018_s0 + $0xb0] sm:$0xff] }
  0x22   :  { %v125_v5 = vsub.f32 1.0, %v124_v55  ;;  %v519_v0 = vpop.eup %518  ;;  %v156_v33 = vsel %vm154_vm4, %v155_v28, %v153_v14  ;;  %v168_v24 = vsel %vm166_vm5, %v167_v29, %v165_v15  ;;  %v192_v34 = vsel %vm191_vm8, %v584_v3, %v190_v16  ;;  %v461_v3 = vld [vmem:[%s1018_s0 + $0x50] sm:$0xff] }
  0x23   :  { %v87_v18 = vadd.f32 %v513_v38, %v86_v59  ;;  %v180_v36 = vsel %vm179_vm6, %v608_v11, %v178_v8  ;;  %vm82_vm0 = vcmp.gt.f32.partialorder %v643_v60, 0.0  ;;  %v144_v28 = vadd.f32 %v674_v26, %v672_v25  ;;  %v465_v55 = vld [vmem:[%s1018_s0 + $0x90] sm:$0xff] }
  0x24   :  { %v126_v19 = vmul.f32 %v517_v51, %v125_v5  ;;  %vm122_vm1 = vcmp.gt.f32.partialorder %v648_v9, 0.0  ;;  %v169_v40 = vsub.f32 %v156_v33, %v168_v24  ;;  %v183_v44 = vsel %vm181_vm10, %v182_v37, %v180_v36  ;;  %v468_v59 = vld [vmem:[%s1019_s1 + $0xb0] sm:$0xff]  ;;  %v471_v36 = vld [vmem:[%s1018_s0 + $0x58] sm:$0xff] }
  0x25   :  { %v91_v7 = vsel %vm724_vm13, %v513_v38, %v87_v18  ;;  %v218_v38 = vmul.f32 %v703_v47, %v217_v23  ;;  %v195_v25 = vsel %vm193_vm11, %v194_v20, %v192_v34  ;;  %v797_v39 = vadd.f32 %v202_v30, %v200_v27  ;;  %v473_v34 = vld [vmem:[%s1018_s0 + $0x78] sm:$0xff] }
  0x26   :  { %v96_v31 = vsel %vm686_vm3, %v95_v35, %v91_v7  ;;  %v127_v32 = vadd.f32 %v517_v51, %v126_v19  ;;  %v205_v35 = vmul.f32 %v519_v0, %v625_v17  ;;  %vm211_vm2 = vcmp.eq.f32.partialorder %v625_v17, inf }
  0x27   :  { %v97_v10 = vmul.f32 %v96_v31, %v643_v60  ;;  %v219_v26 = vmul.f32 0.5, %v218_v38  ;;  %520 = vrsqrt.f32 %v632_v22  ;;  %vm213_vm3 = vcmp.eq.f32.partialorder %v625_v17, 0.0 }
  0x28   :  { %v131_v2 = vsel %vm743_vm15, %v517_v51, %v127_v32  ;;  %v206_v41 = vmul.f32 %v519_v0, %v205_v35  ;;  %v463_v51 = vld [vmem:[%s1018_s0 + $0x70] sm:$0xff]  ;;  %v170_v52 = vmul.f32 %v169_v40, %v169_v40  ;;  %v196_v53 = vsub.f32 %v183_v44, %v195_v25  ;;  %v476_v44 = vld [vmem:[%s1019_s1 + $0x98] sm:$0xff] }
  0x29   :  { %v136_v29 = vsel %vm714_vm12, %v135_v6, %v131_v2  ;;  %v806_v11 = vsel %vm82_vm0, %v97_v10, 0.0  ;;  %v220_v49 = vsub.f32 1.5, %v219_v26  ;;  %v214_v54 = vand.u32 2147483648, %v625_v17  ;;  %v469_v10 = vld [vmem:[%s1018_s0 + $0xd0] sm:$0xff] }
  0x2a   :  { %v137_v43 = vmul.f32 %v136_v29, %v648_v9  ;;  %v207_v48 = vmul.f32 0.5, %v206_v41  ;;  %v464_v9 = vld [vmem:[%s1019_s1 + $0x70] sm:$0xff]  ;;  %vm223_vm4 = vcmp.eq.f32.partialorder %v663_v21, inf  ;;  %vm225_vm5 = vcmp.eq.f32.partialorder %v663_v21, 0.0 }
  0x2b   :  { %v221_v57 = vmul.f32 %v703_v47, %v220_v49  ;;  %522 = vrsqrt.f32 %v778_v42  ;;  %v226_v62 = vand.u32 2147483648, %v663_v21  ;;  %v259_v47 = vsub.f32 %v790_v45, %v806_v11  ;;  %v470_v2 = vld [vmem:[%s1019_s1 + $0xd0] sm:$0xff]  ;;  %v477_v49 = vld [vmem:[%s1018_s0 + $0xb8] sm:$0xff] }
  0x2c   :  { %v810_v37 = vsel %vm122_vm1, %v137_v43, 0.0  ;;  %v208_v60 = vsub.f32 1.5, %v207_v48  ;;  %v272_v5 = vsub.f32 %v461_v3, %v462_v50  ;;  %v278_v6 = vsub.f32 %v463_v51, %v464_v9  ;;  %v475_v43 = vld [vmem:[%s1018_s0 + $0x98] sm:$0xff] }
  0x2d   :  { %v261_v63 = vsub.f32 %v795_v46, %v810_v37  ;;  %v222_v4 = vmul.f32 %v663_v21, %v221_v57  ;;  %v285_v12 = vsub.f32 %v465_v55, %v466_v56  ;;  %v521_v18 = vpop.eup %520  ;;  %v845_v15 = vadd.f32 %v170_v52, %v144_v28  ;;  %v474_v28 = vld [vmem:[%s1019_s1 + $0x78] sm:$0xff]  ;;  %v481_v55 = vld [vmem:[%s1018_s0 + $0x60] sm:$0xff] }
  0x2e   :  { %v209_v61 = vmul.f32 %v519_v0, %v208_v60  ;;  %v847_v13 = vmul.f32 %v196_v53, %v196_v53  ;;  %v292_v19 = vsub.f32 %v467_v58, %v468_v59  ;;  %v232_v20 = vmul.f32 %v521_v18, %v632_v22  ;;  %v478_v50 = vld [vmem:[%s1019_s1 + $0xb8] sm:$0xff]  ;;  %v482_v56 = vld [vmem:[%s1019_s1 + $0x60] sm:$0xff] }
  0x2f   :  { %v224_v14 = vsel %vm223_vm4, %v663_v21, %v222_v4  ;;  %v273_v23 = vmul.f32 %v272_v5, %v272_v5  ;;  %v279_v0 = vmul.f32 %v278_v6, %v278_v6  ;;  %vm238_vm6 = vcmp.eq.f32.partialorder %v632_v22, inf  ;;  %v472_v21 = vld [vmem:[%s1019_s1 + $0x58] sm:$0xff] }
  0x30   :  { %v210_v16 = vmul.f32 %v625_v17, %v209_v61  ;;  %v227_v1 = vsel %vm225_vm5, %v226_v62, %v224_v14  ;;  %v860_v8 = vmul.f32 %v259_v47, %v259_v47  ;;  %v862_v27 = vmul.f32 %v261_v63, %v261_v63  ;;  %v479_v51 = vld [vmem:[%s1018_s0 + $0xd8] sm:$0xff]  ;;  %v483_v62 = vld [vmem:[%s1018_s0 + $0x80] sm:$0xff] }
  0x31   :  { %v523_v30 = vpop.eup %522  ;;  %v233_v32 = vmul.f32 %v521_v18, %v232_v20  ;;  %v280_v33 = vadd.f32 %v279_v0, %v273_v23  ;;  %v286_v24 = vmul.f32 %v285_v12, %v285_v12  ;;  %vm240_vm7 = vcmp.eq.f32.partialorder %v632_v22, 0.0  ;;  %v480_v9 = vld [vmem:[%s1019_s1 + $0xd8] sm:$0xff]  ;;  %v484_v47 = vld [vmem:[%s1019_s1 + $0x80] sm:$0xff] }
  0x32   :  { %v212_v7 = vsel %vm211_vm2, %v625_v17, %v210_v16  ;;  %v241_v17 = vand.u32 2147483648, %v632_v22  ;;  %v244_v38 = vmul.f32 %v523_v30, %v778_v42  ;;  %vm250_vm8 = vcmp.eq.f32.partialorder %v778_v42, inf  ;;  %v485_v12 = vld [vmem:[%s1018_s0 + $0xa0] sm:$0xff] }
  0x33   :  { %v215_v31 = vsel %vm213_vm3, %v214_v54, %v212_v7  ;;  %v234_v29 = vmul.f32 0.5, %v233_v32  ;;  %v287_v40 = vadd.f32 %v286_v24, %v280_v33  ;;  %v293_v41 = vmul.f32 %v292_v19, %v292_v19  ;;  %v486_v16 = vld [vmem:[%s1019_s1 + $0xa0] sm:$0xff] }
  0x34   :  { %v228_v35 = vsub.f32 %v215_v31, %v227_v1  ;;  %v245_v25 = vmul.f32 %v523_v30, %v244_v38  ;;  %vm252_vm9 = vcmp.eq.f32.partialorder %v778_v42, 0.0  ;;  %v253_v26 = vand.u32 2147483648, %v778_v42  ;;  %v488_v0 = vld [vmem:[%s1019_s1 + $0xc0] sm:$0xff]  ;;  %v491_v38 = vld [vmem:[%s1018_s0 + $0x68] sm:$0xff] }
  0x35   :  { %v897_v48 = vmul.f32 0.5, %v862_v27  ;;  %v306_v3 = vsub.f32 %v471_v36, %v472_v21  ;;  %v235_v52 = vsub.f32 1.5, %v234_v29  ;;  %v909_v53 = vmul.f32 0.5, %v860_v8  ;;  %v489_v33 = vld [vmem:[%s1018_s0 + $0xe0] sm:$0xff] }
  0x36   :  { %v299_v60 = vsub.f32 %v469_v10, %v470_v2  ;;  %v312_v54 = vsub.f32 %v473_v34, %v474_v28  ;;  %v229_v57 = vmul.f32 %v228_v35, %v228_v35  ;;  %v246_v58 = vmul.f32 0.5, %v245_v25  ;;  %v490_v24 = vld [vmem:[%s1019_s1 + $0xe0] sm:$0xff]  ;;  %v492_v10 = vld [vmem:[%s1019_s1 + $0x68] sm:$0xff] }
  0x37   :  { %v307_v59 = vmul.f32 %v306_v3, %v306_v3  ;;  %v319_v61 = vsub.f32 %v475_v43, %v476_v44  ;;  %v236_v63 = vmul.f32 %v521_v18, %v235_v52  ;;  %v926_v4 = vadd.f32 %v293_v41, %v287_v40  ;;  %v487_v18 = vld [vmem:[%s1018_s0 + $0xc0] sm:$0xff]  ;;  %v493_v2 = vld [vmem:[%s1018_s0 + $0x88] sm:$0xff] }
  0x38   :  { %v313_v5 = vmul.f32 %v312_v54, %v312_v54  ;;  %v326_v6 = vsub.f32 %v477_v49, %v478_v50  ;;  %v247_v19 = vsub.f32 1.5, %v246_v58  ;;  %v333_v20 = vsub.f32 %v479_v51, %v480_v9  ;;  %v494_v41 = vld [vmem:[%s1019_s1 + $0x88] sm:$0xff] }
  0x39   :  { %v320_v14 = vmul.f32 %v319_v61, %v319_v61  ;;  %v340_v23 = vsub.f32 %v481_v55, %v482_v56  ;;  %v237_v7 = vmul.f32 %v632_v22, %v236_v63  ;;  %v300_v1 = vmul.f32 %v299_v60, %v299_v60  ;;  %v495_v43 = vld [vmem:[%s1018_s0 + $0xa8] sm:$0xff] }
  0x3a   :  { %v314_v31 = vadd.f32 %v313_v5, %v307_v59  ;;  %v346_v32 = vsub.f32 %v483_v62, %v484_v47  ;;  %v248_v36 = vmul.f32 %v523_v30, %v247_v19  ;;  %v327_v21 = vmul.f32 %v326_v6, %v326_v6  ;;  %v496_v44 = vld [vmem:[%s1019_s1 + $0xa8] sm:$0xff] }
  0x3b   :  { %v341_v34 = vmul.f32 %v340_v23, %v340_v23  ;;  %v353_v35 = vsub.f32 %v485_v12, %v486_v16  ;;  %vm139_vm10 = vcmp.ge.f32.partialorder %v806_v11, %v810_v37  ;;  %v239_v30 = vsel %vm238_vm6, %v632_v22, %v237_v7  ;;  %v497_v9 = vld [vmem:[%s1018_s0 + $0xc8] sm:$0xff] }
  0x3c   :  { %v321_v28 = vadd.f32 %v320_v14, %v314_v31  ;;  %v347_v29 = vmul.f32 %v346_v32, %v346_v32  ;;  %v360_v40 = vsub.f32 %v487_v18, %v488_v0  ;;  %v230_v25 = vadd.f32 %v229_v57, %v797_v39  ;;  %v498_v39 = vld [vmem:[%s1019_s1 + $0xc8] sm:$0xff] }
  0x3d   :  { %v249_v3 = vmul.f32 %v778_v42, %v248_v36  ;;  %v334_v49 = vmul.f32 %v333_v20, %v333_v20  ;;  %v354_v50 = vmul.f32 %v353_v35, %v353_v35  ;;  %v242_v51 = vsel %vm240_vm7, %v241_v17, %v239_v30  ;;  %v499_v22 = vld [vmem:[%s1018_s0 + $0xe8] sm:$0xff] }
  0x3e   :  { %v348_v52 = vadd.f32 %v347_v29, %v341_v34  ;;  %v367_v60 = vsub.f32 %v489_v33, %v490_v24  ;;  %v374_v54 = vsub.f32 %v491_v38, %v492_v10  ;;  %v361_v56 = vmul.f32 %v360_v40, %v360_v40  ;;  %v500_v17 = vld [vmem:[%s1019_s1 + $0xe8] sm:$0xff] }
  0x3f   :  { %v251_v55 = vsel %vm250_vm8, %v778_v42, %v249_v3  ;;  %v380_v57 = vsub.f32 %v493_v2, %v494_v41  ;;  %v387_v58 = vsub.f32 %v495_v43, %v496_v44  ;;  %v328_v61 = vadd.f32 %v327_v21, %v321_v28  ;;  %v447_v21 = vld [vmem:[%s1019_s1 + $0x20] sm:$0xff] }
  0x40   :  { %v254_v59 = vsel %vm252_vm9, %v253_v26, %v251_v55  ;;  %v355_v62 = vadd.f32 %v354_v50, %v348_v52  ;;  %v375_v47 = vmul.f32 %v374_v54, %v374_v54  ;;  %v394_v12 = vsub.f32 %v497_v9, %v498_v39 }
  0x41   :  { %v255_v63 = vsub.f32 %v242_v51, %v254_v59  ;;  %v381_v5 = vmul.f32 %v380_v57, %v380_v57  ;;  %v388_v6 = vmul.f32 %v387_v58, %v387_v58  ;;  %v198_v16 = vadd.f32 %v847_v13, %v845_v15 }
  0x42   :  { %v264_v19 = vadd.f32 %v897_v48, %v860_v8  ;;  %v368_v14 = vmul.f32 %v367_v60, %v367_v60  ;;  %v401_v20 = vsub.f32 %v499_v22, %v500_v17  ;;  %v362_v18 = vadd.f32 %v361_v56, %v355_v62 }
  0x43   :  { %v256_v23 = vmul.f32 %v255_v63, %v255_v63  ;;  %v382_v0 = vadd.f32 %v381_v5, %v375_v47  ;;  %v395_v42 = vmul.f32 %v394_v12, %v394_v12  ;;  %v266_v26 = vadd.f32 %v909_v53, %v862_v27 }
  0x44   :  { %v301_v7 = vadd.f32 %v300_v1, %v926_v4  ;;  %v335_v31 = vadd.f32 %v334_v49, %v328_v61  ;;  %v407_v32 = vmul.f32 %v790_v45, %v790_v45  ;;  %v402_v13 = vmul.f32 %v401_v20, %v401_v20 }
  0x45   :  { %v257_v33 = vadd.f32 %v256_v23, %v230_v25  ;;  %v389_v15 = vadd.f32 %v388_v6, %v382_v0  ;;  %v408_v8 = vmul.f32 %v795_v46, %v795_v46  ;;  %v369_v24 = vadd.f32 %v368_v14, %v362_v18 }
  0x46   :  { %v267_v27 = vsel %vm139_vm10, %v264_v19, %v266_v26  ;;  %v404_v1 = vadd.f32 %v335_v31, %v301_v7  ;;  %vm411_vm11 = vcmp.eq.f32.partialorder %v447_v21, 1.0  ;;  %vm426_vm12 = vcmask 0  }
  0x47   :  { %v258_v48 = vsel %vm139_vm10, %v198_v16, %v257_v33  ;;  %v396_v36 = vadd.f32 %v395_v42, %v389_v15  ;;  %v409_v45 = vadd.f32 %v408_v8, %v407_v32 }
  0x48   :  { %v412_v53 = vmul.f32 5.0, %v258_v48 }
  0x49   :  { %v403_v4 = vadd.f32 %v402_v13, %v396_v36  ;;  %v410_v38 = vmul.f32 0.5, %v409_v45 }
  0x4a   :  { %v413_v46 = vadd.f32 %v412_v53, %v267_v27 }
  0x4b   :  { %v405_v34 = vadd.f32 %v403_v4, %v369_v24 }
  0x4d   :  { %v406_v35 = vadd.f32 %v405_v34, %v404_v1 }
  0x4f   :  { %v414_v10 = vadd.f32 %v413_v46, %v406_v35 }
  0x51   :  { %v415_v2 = vsel %vm411_vm11, %v414_v10, %v410_v38 }
  0x52   :  { %416 = vadd.xlane.f32.xlu0 %v415_v2 }
  0xc5   :  { %v417_v30 = vpop.xlane.xlu0 %416 }
  0xc6   :  { %v418_v28 = vrot.slane %v417_v30, 4 }
  0xc8   :  { %v419_v11 = vadd.f32 %v418_v28, %v417_v30 }
  0xca   :  { %v420_v37 = vrot.slane %v419_v11, 2 }
  0xcc   :  { %v421_v29 = vadd.f32 %v420_v37, %v419_v11 }
  0xce   :  { %v422_v40 = vrot.slane %v421_v29, 1 }
  0xd0   :  { %v423_v41 = vadd.f32 %v422_v40, %v421_v29 }
  0xd2   :  { %501 = vpush %v423_v41 }
 0x103   :  { %s502_s18 = spop %501 }
 0x104   :  { %v425_v43 = vstv %s502_s18 }
 0x105   :  { %427 = vst.msk [vmem:[#allocation2] sm:$0x1] %vm426_vm12, %v425_v43 }
 0x106   :  { %438 = dma.vmem_to_hbm [thread:$0]  %s434_s15, 16, %s436_s17, [#allocation3]  }
 0x107   :  { %548 = dma.done.wait [#allocation3], 16  }
 0x108   :  { %549 = vsyncadd [#allocation3], 4294967280 }
 0x109   :  { %443 = vsyncpa [#allocation3], 1 }

</bundles_post_ra>
